<compile_context>
chip_gen: v7x
topology: tpu7x:2x2x1
jax: 0.10.0
libtpu: 0.0.40
codegen_flags: <defaults>
</compile_context>

<pallas_src>
import math

import jax
import jax.numpy as jnp
from jax.experimental import pallas as pl
from jax.experimental.pallas import tpu as pltpu


def _round_up(x, m):
    return ((x + m - 1) // m) * m


def proj_dec_kernel(x_ref, w1_ref, b1_ref, w2_ref, b2_ref, out_ref):
    """One row tile: fc1 -> ELU -> fc2, single lane-dense store."""
    x = x_ref[...]                                           # (TM, in_dim) bf16
    # fc1: bf16 MXU inputs, f32 accumulation; bias add in f32.
    h = jnp.dot(x, w1_ref[...], preferred_element_type=jnp.float32) + b1_ref[...]
    # ELU (alpha=1) in f32: h if h > 0 else exp(h) - 1   (exp on the EUP slot).
    h = jnp.where(h > 0.0, h, jnp.exp(jnp.minimum(h, 0.0)) - 1.0)
    # fc2: cast activation to the weight compute dtype for the MXU, f32 acc.
    o = jnp.dot(h.astype(w2_ref.dtype), w2_ref[...],
                preferred_element_type=jnp.float32) + b2_ref[...]
    out_ref[...] = o.astype(out_ref.dtype)


def prepare_params(params, *, compute_dtype=jnp.bfloat16):
    """One-time layout prep (out of the hot path) from torch-layout params.

    W1:(hid,in) W2:(out,hid) -> transposed, bf16, out columns zero-padded to a
    multiple of 128 so the kernel's output store is lane-dense.
    """
    W1, b1, W2, b2 = params
    hid, in_dim = W1.shape
    out_dim = W2.shape[0]
    out_pad = out_dim if out_dim % 128 == 0 else _round_up(out_dim, 128)

    w1t = jnp.asarray(W1).T.astype(compute_dtype)            # (in_dim, hid)
    w2t = jnp.asarray(W2).T.astype(compute_dtype)            # (hid, out_dim)
    b2p = jnp.asarray(b2).astype(jnp.float32)
    if out_pad != out_dim:
        w2t = jnp.pad(w2t, ((0, 0), (0, out_pad - out_dim)))
        b2p = jnp.pad(b2p, (0, out_pad - out_dim))
    b1r = jnp.asarray(b1).astype(jnp.float32).reshape(1, hid)
    b2r = b2p.reshape(1, out_pad)
    return {
        "w1t": w1t, "b1": b1r, "w2t": w2t, "b2": b2r,
        "in_dim": in_dim, "hid": hid, "out_dim": out_dim, "out_pad": out_pad,
    }


def proj_dec(y, prepped, *, tm=256):
    """y: (..., in_dim) -> (..., out_dim); matches torch Proj_dec.forward."""
    in_dim = prepped["in_dim"]
    hid = prepped["hid"]
    out_dim = prepped["out_dim"]
    out_pad = prepped["out_pad"]
    w1t, b1r, w2t, b2r = prepped["w1t"], prepped["b1"], prepped["w2t"], prepped["b2"]
    compute_dtype = w1t.dtype
    out_dtype = y.dtype

    assert y.shape[-1] == in_dim
    lead = y.shape[:-1]
    rows = math.prod(lead) if lead else 1

    # Fold batch into the matmul M dimension; feed the MXU bf16.
    x = y.reshape(rows, in_dim).astype(compute_dtype)

    # Row tile: multiple of 8 sublanes, capped at tm; prefer >= 2 grid steps so
    # the parallel row axis can use both TensorCores. No jnp.pad: the edge
    # block may be partial (rows are independent; edge rows are masked).
    tile = min(tm, _round_up(rows, 8))
    if rows > 8 and pl.cdiv(rows, tile) < 2:
        tile = max(8, _round_up(pl.cdiv(rows, 2), 8))
    grid = (pl.cdiv(rows, tile),)

    # VMEM budget (weights single-buffered, x/out tiles double-buffered).
    csize = jnp.dtype(compute_dtype).itemsize
    osize = jnp.dtype(out_dtype).itemsize
    w_bytes = (in_dim * hid + hid * out_pad) * csize
    b_bytes = (hid + out_pad) * 4
    x_bytes = 2 * tile * in_dim * csize
    o_bytes = 2 * tile * out_pad * osize
    h_bytes = tile * hid * 4
    vmem_limit = int(1.5 * (w_bytes + b_bytes + x_bytes + o_bytes + h_bytes)) + (2 << 20)
    vmem_limit = max(min(vmem_limit, 64 << 20), 4 << 20)

    cost = pl.CostEstimate(
        flops=2 * rows * (in_dim * hid + hid * out_pad),
        transcendentals=rows * hid,
        bytes_accessed=(rows * in_dim * csize + w_bytes + b_bytes
                        + rows * out_pad * osize),
    )

    resident = pl.Buffered(1)    # constant index_map -> one buffer is enough

    out = pl.pallas_call(
        proj_dec_kernel,
        out_shape=jax.ShapeDtypeStruct((rows, out_pad), out_dtype),
        grid_spec=pltpu.PrefetchScalarGridSpec(
            num_scalar_prefetch=0,
            grid=grid,
            in_specs=[
                pl.BlockSpec((tile, in_dim), lambda i: (i, 0)),                       # x tile
                pl.BlockSpec((in_dim, hid), lambda i: (0, 0), pipeline_mode=resident),  # W1^T
                pl.BlockSpec((1, hid), lambda i: (0, 0), pipeline_mode=resident),       # b1
                pl.BlockSpec((hid, out_pad), lambda i: (0, 0), pipeline_mode=resident), # W2^T
                pl.BlockSpec((1, out_pad), lambda i: (0, 0), pipeline_mode=resident),   # b2
            ],
            out_specs=pl.BlockSpec((tile, out_pad), lambda i: (i, 0)),
        ),
        compiler_params=pltpu.CompilerParams(
            dimension_semantics=("parallel",),
            vmem_limit_bytes=vmem_limit,
        ),
        cost_estimate=cost,
    )(x, w1t, b1r, w2t, b2r)

    if out_pad != out_dim:
        out = out[:, :out_dim]
    return out.reshape(*lead, out_dim)


def ref_forward(y, params):
    """Pure-JAX f32 reference matching PyTorch Linear/ELU semantics."""
    W1, b1, W2, b2 = params
    h = y @ W1.T + b1
    h = jnp.where(h > 0.0, h, jnp.exp(jnp.minimum(h, 0.0)) - 1.0)   # ELU, alpha=1
    return h @ W2.T + b2


def init_params(key, in_dim, hid_dim, out_dim):
    """Deterministic synthetic parameters in PyTorch layouts."""
    ks = jax.random.split(key, 4)
    W1 = 0.1 * jax.random.normal(ks[0], (hid_dim, in_dim), jnp.float32)
    b1 = 0.1 * jax.random.normal(ks[1], (hid_dim,), jnp.float32)
    W2 = 0.1 * jax.random.normal(ks[2], (out_dim, hid_dim), jnp.float32)
    b2 = 0.1 * jax.random.normal(ks[3], (out_dim,), jnp.float32)
    return (W1, b1, W2, b2)


if __name__ == "__main__":
    # Small shapes consistent with the module: y is (batch, seq, in_dim).
    in_dim, hid_dim, out_dim = 32, 64, 32
    B, S = 2, 8

    key = jax.random.PRNGKey(0)
    ky, kp = jax.random.split(key)
    y = jax.random.normal(ky, (B, S, in_dim), jnp.float32)
    params = init_params(kp, in_dim, hid_dim, out_dim)

    prepped = prepare_params(params)       # one-time layout prep (not per call)
    out = proj_dec(y, prepped)             # rows=16 -> tile=8, grid=(2,) parallel
    out = jax.block_until_ready(out)

    expected = ref_forward(y, params)
    assert out.shape == (B, S, out_dim), out.shape
    # bf16 MXU inputs (f32 accumulation) -> looser tolerance vs. f32 reference.
    assert jnp.allclose(out, expected, atol=2e-2, rtol=2e-2), "mismatch vs reference"

    print("KERNEL_OK")
</pallas_src>

<mosaic_0001>
module attributes {stable_mosaic.version = 11 : i64} {
  func.func @proj_dec_kernel(%arg0: i32, %arg1: memref<8x32xbf16, #tpu.memory_space<vmem>>, %arg2: memref<32x64xbf16, #tpu.memory_space<vmem>>, %arg3: memref<1x64xf32, #tpu.memory_space<vmem>>, %arg4: memref<64x128xbf16, #tpu.memory_space<vmem>>, %arg5: memref<1x128xf32, #tpu.memory_space<vmem>>, %arg6: memref<8x128xf32, #tpu.memory_space<vmem>>) attributes {dimension_semantics = [#tpu.dimension_semantics<parallel>], iteration_bounds = array<i64: 2>, scalar_prefetch = 0 : i64, scratch_operands = 0 : i64, tpu.core_type = #tpu.core_type<tc>, window_params = [{transform_indices = @transform_0, window_bounds = array<i64: 8, 32>}, {pipeline_mode = #tpu.pipeline_mode<synchronous>, transform_indices = @transform_1, window_bounds = array<i64: 32, 64>}, {pipeline_mode = #tpu.pipeline_mode<synchronous>, transform_indices = @transform_2, window_bounds = array<i64: 1, 64>}, {pipeline_mode = #tpu.pipeline_mode<synchronous>, transform_indices = @transform_3, window_bounds = array<i64: 64, 128>}, {pipeline_mode = #tpu.pipeline_mode<synchronous>, transform_indices = @transform_4, window_bounds = array<i64: 1, 128>}, {transform_indices = @transform_5, window_bounds = array<i64: 8, 128>}]} {
    %c0 = arith.constant 0 : index
    %c0_0 = arith.constant 0 : index
    %0 = vector.load %arg1[%c0, %c0_0] : memref<8x32xbf16, #tpu.memory_space<vmem>>, vector<8x32xbf16>
    %c0_1 = arith.constant 0 : index
    %c0_2 = arith.constant 0 : index
    %1 = vector.load %arg2[%c0_1, %c0_2] : memref<32x64xbf16, #tpu.memory_space<vmem>>, vector<32x64xbf16>
    %cst = arith.constant dense<0.000000e+00> : vector<8x64xf32>
    %2 = tpu.matmul %0, %1, %cst {dimension_numbers = #tpu.dot_dimension_numbers<[1], [0], [0], [1], [0, 0, 1, 1], [], []>} : vector<8x32xbf16>, vector<32x64xbf16>, vector<8x64xf32> -> vector<8x64xf32>
    %c0_3 = arith.constant 0 : index
    %c0_4 = arith.constant 0 : index
    %3 = vector.load %arg3[%c0_3, %c0_4] : memref<1x64xf32, #tpu.memory_space<vmem>>, vector<1x64xf32>
    %4 = vector.broadcast %3 : vector<1x64xf32> to vector<8x64xf32>
    %5 = arith.addf %2, %4 : vector<8x64xf32>
    %cst_5 = arith.constant 0.000000e+00 : f32
    %6 = vector.broadcast %cst_5 : f32 to vector<8x64xf32>
    %7 = arith.cmpf ogt, %5, %6 : vector<8x64xf32>
    %cst_6 = arith.constant 0.000000e+00 : f32
    %8 = vector.broadcast %cst_6 : f32 to vector<8x64xf32>
    %9 = arith.minimumf %5, %8 : vector<8x64xf32>
    %10 = math.exp %9 : vector<8x64xf32>
    %cst_7 = arith.constant 1.000000e+00 : f32
    %11 = vector.broadcast %cst_7 : f32 to vector<8x64xf32>
    %12 = arith.subf %10, %11 : vector<8x64xf32>
    %13 = arith.select %7, %5, %12 : vector<8x64xi1>, vector<8x64xf32>
    %14 = arith.truncf %13 : vector<8x64xf32> to vector<8x64xbf16>
    %c0_8 = arith.constant 0 : index
    %c0_9 = arith.constant 0 : index
    %15 = vector.load %arg4[%c0_8, %c0_9] : memref<64x128xbf16, #tpu.memory_space<vmem>>, vector<64x128xbf16>
    %cst_10 = arith.constant dense<0.000000e+00> : vector<8x128xf32>
    %16 = tpu.matmul %14, %15, %cst_10 {dimension_numbers = #tpu.dot_dimension_numbers<[1], [0], [0], [1], [0, 0, 1, 1], [], []>} : vector<8x64xbf16>, vector<64x128xbf16>, vector<8x128xf32> -> vector<8x128xf32>
    %c0_11 = arith.constant 0 : index
    %c0_12 = arith.constant 0 : index
    %17 = vector.load %arg5[%c0_11, %c0_12] : memref<1x128xf32, #tpu.memory_space<vmem>>, vector<1x128xf32>
    %18 = vector.broadcast %17 : vector<1x128xf32> to vector<8x128xf32>
    %19 = arith.addf %16, %18 : vector<8x128xf32>
    %c0_13 = arith.constant 0 : index
    %c0_14 = arith.constant 0 : index
    %20 = vector.load %arg6[%c0_13, %c0_14] : memref<8x128xf32, #tpu.memory_space<vmem>>, vector<8x128xf32>
    tpu.vector_store %arg6[%c0_13, %c0_14], %19 {strides = array<i32>} : memref<8x128xf32, #tpu.memory_space<vmem>>, vector<8x128xf32>,
    return
  }
  func.func @transform_0(%arg0: i32) -> (i32, i32) {
    %c0_i32 = arith.constant 0 : i32
    %c0_i32_0 = arith.constant 0 : i32
    return %arg0, %c0_i32 : i32, i32
  }
  func.func @transform_1(%arg0: i32) -> (i32, i32) {
    %c0_i32 = arith.constant 0 : i32
    %c0_i32_0 = arith.constant 0 : i32
    %c0_i32_1 = arith.constant 0 : i32
    return %c0_i32, %c0_i32_0 : i32, i32
  }
  func.func @transform_2(%arg0: i32) -> (i32, i32) {
    %c0_i32 = arith.constant 0 : i32
    %c0_i32_0 = arith.constant 0 : i32
    %c0_i32_1 = arith.constant 0 : i32
    return %c0_i32, %c0_i32_0 : i32, i32
  }
  func.func @transform_3(%arg0: i32) -> (i32, i32) {
    %c0_i32 = arith.constant 0 : i32
    %c0_i32_0 = arith.constant 0 : i32
    %c0_i32_1 = arith.constant 0 : i32
    return %c0_i32, %c0_i32_0 : i32, i32
  }
  func.func @transform_4(%arg0: i32) -> (i32, i32) {
    %c0_i32 = arith.constant 0 : i32
    %c0_i32_0 = arith.constant 0 : i32
    %c0_i32_1 = arith.constant 0 : i32
    return %c0_i32, %c0_i32_0 : i32, i32
  }
  func.func @transform_5(%arg0: i32) -> (i32, i32) {
    %c0_i32 = arith.constant 0 : i32
    %c0_i32_0 = arith.constant 0 : i32
    return %arg0, %c0_i32 : i32, i32
  }
}

</mosaic_0001>

<bundles_post_ra>
// kernel: tpu_custom_call.1
= control target key start
LH: loop header
LB: loop body
LE: loop exit
PB: predicated region body
PF: predicated region fallthrough
CT: control target
= control target key end

     0   :  { %10 = vsyncpa [#allocation3], 0  ;;  %s1098_s0 = inlined_call_operand.hbm [shape: bf16[16,32], index: 0, kind: input, shape index: {}]   ;;  %s1099_s1 = inlined_call_operand.hbm [shape: bf16[32,64], index: 1, kind: input, shape index: {}]   ;;  %s1100_s2 = inlined_call_operand.vmem [shape: f32[1,64], index: 2, kind: input, shape index: {}]   ;;  %s1101_s3 = inlined_call_operand.hbm [shape: bf16[64,128], index: 3, kind: input, shape index: {}]   ;;  %s1102_s4 = inlined_call_operand.vmem [shape: f32[1,128], index: 4, kind: input, shape index: {}]   ;;  %s1103_s5 = inlined_call_operand.hbm [shape: f32[16,128], index: 5, kind: output, shape index: {}]  }
   0x1   :  { %12 = vsyncpa [#allocation3 + $0x1], 0 }
   0x2   :  { %13 = vsyncpa [#allocation6], 0 }
   0x3   :  { %14 = vsyncpa [#allocation4], 0 }
   0x4   :  { %16 = vsyncpa [#allocation4 + $0x1], 0  ;;  %s862_s18 = smov 0   ;;  %s864_s19 = smov 0  }
   0x5   :  { %s866_s20 = smov 0   ;;  %s868_s21 = smov 0  }
   0x6 LB: > { %s883_s22 = sadd.s32 4294967295, %s822_s21   ;;  %s532_s23 = sadd.s32 4294967294, %s822_s21   ;;  %s822_s21 = sphi %s868_s21, %s1123_s21   ;;  %s818_s20 = sphi %s866_s20, %s1122_s20   ;;  %s814_s19 = sphi %s864_s19, %s1121_s19   ;;  %s810_s18 = sphi %s862_s18, %s1120_s18  }
   0x7   : > { %p42_p0 = scmp.ne.s32.totalorder %s814_s19, %s810_s18  ;;  %p1104_p1 = scmp.eq.s32.totalorder %s883_s22, 0 }
   0x8   : > { %p156_p3 = scmp.eq.s32.totalorder %s532_s23, 1  ;;  %p533_p5 = scmp.ge.s32.totalorder %s822_s21, 1 }
   0x9   : > { %p892_p4 = por %p1104_p1, %p42_p0  ;;  %p163_p7 = scmp.lt.s32.totalorder %s822_s21, 3 }
   0xa   : > { %p897_p6 = por %p156_p3, %p42_p0  ;;  %s824_s27 = smov [#allocation5]  }
   0xb   : > { %s1107_s24 = scalar_select %p892_p4, 1, 0 }
   0xc   : > { %s1108_s25 = scalar_select %p897_p6, 1, 0 }
   0xd   : > { %p902_p8 = pnand %p533_p5, %p163_p7  ;;  %s175_s28 = sshll.u32 %s824_s27, 4  ;;  %s906_s28 = int_to_ptr.vmem [resolvable:$true] %s175_s28 }
   0xe   : > { %s825_s30 = smov [#allocation7]   ;;  %s666_s9 = scalar_lea.hbm %s1099_s1, 256 }
   0xf   : > { %p599_p9 = pneg %p902_p8  ;;  %s191_s6 = sshll.u32 %s825_s30, 4  ;;  %s917_s6 = int_to_ptr.vmem [resolvable:$true] %s191_s6 }
  0x10   : > { %p667_p12 = scmp.ne.s32.totalorder %s1099_s1, %s666_s9  ;;  %p673_p5 = scmp.lt.u32.totalorder %s666_s9, %s1099_s1 }
  0x11   : > { %p913_p11 = pnand %p599_p9, %p1104_p1 }
  0x13   : > { %p668_p13 = pneg %p913_p11 }
  0x15   : > { %p669_p0 = pnand %p668_p13, %p667_p12 }
  0x17   : > { %p670_p3 = pneg %p669_p0 }
  0x19   : > { %p675_p7 = pnand %p673_p5, %p670_p3 }
  0x1b   : > { %678 = shalt.err (!%p675_p7)
}
  0x1c   : > { %s679_s14 = scalar_lea.vmem %s906_s28, 256  ;;  %p687_p2 = scmp.lt.s32.totalorder %s906_s28, %s906_s28 }
  0x1d   : > { %p680_p9 = scmp.ne.s32.totalorder %s906_s28, %s679_s14  ;;  %p688_p12 = scmp.lt.s32.totalorder %s679_s14, %s679_s14 }
  0x1f   : > { %p682_p10 = pnand %p680_p9, %p668_p13  ;;  %p689_p0 = por %p688_p12, %p687_p2 }
  0x21   : > { %p683_p1 = pneg %p682_p10 }
  0x23   : > { %p690_p6 = pnand %p689_p0, %p683_p1 }
  0x25   : > { %693 = shalt.err (!%p690_p6)
}
  0x26   : > { %s826_s15 = smov 64   ;;  %s827_s16 = smov 4  }
  0x27   : > { %602 = dma.hbm_to_vmem [thread:$0]  (!%p913_p11), %s1099_s1, 256, %s906_s28, [#allocation6], %s826_s15, %s826_s15, %s827_s16  }
  0x28   : > { %s694_s7 = scalar_lea.hbm %s1101_s3, 512 }
  0x29   : > { %p695_p2 = scmp.ne.s32.totalorder %s1101_s3, %s694_s7  ;;  %p701_p10 = scmp.lt.u32.totalorder %s694_s7, %s1101_s3 }
  0x2b   : > { %p697_p1 = pnand %p695_p2, %p668_p13 }
  0x2d   : > { %p698_p6 = pneg %p697_p1 }
  0x2f   : > { %p703_p3 = pnand %p701_p10, %p698_p6 }
  0x31   : > { %706 = shalt.err (!%p703_p3)
}
  0x32   : > { %s707_s28 = scalar_lea.vmem %s917_s6, 512  ;;  %p715_p12 = scmp.lt.s32.totalorder %s917_s6, %s917_s6 }
  0x33   : > { %p708_p5 = scmp.ne.s32.totalorder %s917_s6, %s707_s28  ;;  %p716_p0 = scmp.lt.s32.totalorder %s707_s28, %s707_s28 }
  0x35   : > { %p710_p7 = pnand %p708_p5, %p668_p13  ;;  %p717_p2 = por %p716_p0, %p715_p12 }
  0x37   : > { %p711_p9 = pneg %p710_p7 }
  0x39   : > { %p718_p1 = pnand %p717_p2, %p711_p9 }
  0x3b   : > { %721 = shalt.err (!%p718_p1)
}
  0x3c   : > { %605 = dma.hbm_to_vmem [thread:$0]  (!%p913_p11), %s1101_s3, 512, %s917_s6, [#allocation6], %s826_s15, %s826_s15, %s827_s16  }
  0x3d   : > { %s972_s14 = sadd.s32 1, %s822_s21   ;;  %s29_s29 = sadd.s32 1, %s818_s20 }
  0x3e   : > { %s26_s17 = ssub.s32 %s822_s21, %s972_s14  ;;  %p36_p13 = scmp.ne.s32.totalorder %s818_s20, %s814_s19 }
  0x3f   : > { %p27_p6 = scmp.eq.s32.totalorder %s26_s17, 0  ;;  %p37_p10 = scmp.eq.s32.totalorder %s822_s21, 0 }
  0x40   : > { %p1111_p3 = scmp.eq.s32.totalorder %s883_s22, 1  ;;  %p616_p7 = scmp.lt.s32.totalorder %s822_s21, 2 }
  0x41   : > { %s988_s27 = scalar_select %p27_p6, %s818_s20, %s29_s29  }
  0x42   : > { %p982_p5 = por %p1111_p3, %p36_p13  ;;  %p38_p9 = por %p37_p10, %p36_p13 }
  0x43   : > { %s208_s30 = sand.u32 1, %s818_s20   ;;  %s538_s6 = sshll.u32 %s822_s21, 6 }
  0x44   : > { %s1112_s23 = scalar_select %p982_p5, 1, 0 }
  0x45   : > { %s537_s7 = sshll.u32 %s208_s30, 2  ;;  %s995_s8 = scalar_lea.hbm %s1098_s0, %s538_s6 }
  0x46   : > { %s212_s9 = scalar_lea.vmem [#allocation2], %s537_s7  ;;  %p999_p11 = pnand %p616_p7, %p38_p9 }
  0x47   : > { %s219_s10 = sshll.u32 %s212_s9, 4  ;;  %s209_s28 = scalar_lea.sflag [#allocation3], %s208_s30  ;;  %s997_s10 = int_to_ptr.vmem [resolvable:$true] %s219_s10 }
  0x48   : > { %s722_s12 = scalar_lea.hbm %s995_s8, 64  ;;  %p724_p0 = pneg %p999_p11 }
  0x49   : > { %p723_p12 = scmp.ne.s32.totalorder %s995_s8, %s722_s12  ;;  %s727_s17 = scalar_lea.hbm %s1098_s0, 128 }
  0x4a   : > { %p728_p13 = scmp.lt.u32.totalorder %s995_s8, %s1098_s0  ;;  %p729_p6 = scmp.lt.u32.totalorder %s727_s17, %s722_s12 }
  0x4b   : > { %p725_p2 = pnand %p724_p0, %p723_p12  ;;  %p731_p3 = scmp.lt.u32.totalorder %s722_s12, %s995_s8 }
  0x4c   : > { %p730_p10 = por %p729_p6, %p728_p13 }
  0x4d   : > { %p726_p1 = pneg %p725_p2 }
  0x4e   : > { %p732_p7 = por %p731_p3, %p730_p10 }
  0x50   : > { %p733_p9 = pnand %p732_p7, %p726_p1 }
  0x52   : > { %736 = shalt.err (!%p733_p9)
}
  0x53   : > { %s737_s30 = scalar_lea.vmem %s997_s10, 64  ;;  %s828_s15 = smov [#allocation2]  }
  0x54   : > { %p738_p12 = scmp.ne.s32.totalorder %s997_s10, %s737_s30  ;;  %s742_s16 = sshll.u32 %s828_s15, 4  ;;  %s743_s16 = int_to_ptr.vmem [resolvable:$false] %s742_s16 }
  0x55   : > { %s744_s9 = scalar_lea.vmem %s743_s16, 128  ;;  %p745_p4 = scmp.lt.s32.totalorder %s997_s10, %s743_s16 }
  0x56   : > { %p740_p2 = pnand %p738_p12, %p724_p0  ;;  %p746_p13 = scmp.lt.s32.totalorder %s744_s9, %s737_s30 }
  0x58   : > { %p741_p5 = pneg %p740_p2  ;;  %p747_p6 = por %p746_p13, %p745_p4 }
  0x5a   : > { %p748_p10 = pnand %p747_p6, %p741_p5 }
  0x5c   : > { %751 = shalt.err (!%p748_p10)
}
  0x5d   : > { %609 = dma.hbm_to_vmem [thread:$0]  (!%p999_p11), %s995_s8, 64, %s997_s10, %s209_s28  }
  0x5e   : > { %228 = sbr.rel (%p902_p8) target bundleno = 577 (0x241), region = 40  ;;  %s1031_s12 = sand.u32 (!%p902_p8), 1, %s814_s19  }
  0x5f   : > { %s540_s13 = sshll.u32 (!%p902_p8), %s1031_s12, 2  ;;  %s231_s29 = scalar_lea.sflag (!%p902_p8), [#allocation3], %s1031_s12 }
  0x60   : > { %s234_s17 = scalar_lea.vmem (!%p902_p8), [#allocation2], %s540_s13  ;;  %p1114_p4 = scmp.ne.s32.totalorder (!%p902_p8), %s1107_s24, 0 }
  0x65   : > { %797 = dma.done.wait (%p1114_p4), %s231_s29, 64  }
  0x66   : > { %799 = vsyncadd (%p1114_p4), %s231_s29, 4294967232  ;;  %p1115_p5 = scmp.eq.s32.totalorder %s883_s22, 0 }
  0x68   : > { %801 = dma.done.wait (%p1115_p5), [#allocation6], 768   ;;  %p1116_p11 = pmov %p1115_p5 }
  0x69   : > { %v829_v0 = vmov 0.0   ;;  %vm830_vm0 = vmmov 0   ;;  %v658_v1 = vld [vmem:[#allocation5] sm:$0xff]   ;;  %v659_v2 = vld [vmem:[#allocation5 + $0x8] sm:$0xff]   ;;  %v270_v3 = vld [vmem:[%s234_s17] sm:$0xf] }
  0x6a   : > { %803 = vsyncadd (%p1116_p11), [#allocation6], 4294966528  ;;  %567 = vmatprep.subr.bf16.mxu0 %v829_v0  ;;  %571 = vmatprep.mubr.msk.bf16.mxu0 %vm830_vm0, %v829_v0  ;;  %vm294_vm1 = vcmask 261120   ;;  %v660_v4 = vld [vmem:[#allocation7] sm:$0xff]   ;;  %v661_v5 = vld [vmem:[#allocation7 + $0x8] sm:$0xff]   ;;  %vm384_vm3 = vcmask 523264  }
  0x6b   : > { %575 = vmatprep.subr.bf16.mxu1 %v829_v0  ;;  %583 = vmatprep.mubr.msk.bf16.mxu1 %vm830_vm0, %v829_v0  ;;  %v662_v6 = vld [vmem:[#allocation7 + $0x10] sm:$0xff]   ;;  %v663_v7 = vld [vmem:[#allocation7 + $0x18] sm:$0xff]   ;;  %v544_v8 = vld [vmem:[%s1100_s2] ss:$0 sm:$0xff]  ;;  %s543_s8 = sshll.u32 %s1031_s12, 3  ;;  %s556_s28 = sshll.u32 %s883_s22, 7 }
  0x6c   : > { %568 = vmatpush3.bf16.msra.mxu0 %v658_v1  ;;  %576 = vmatpush3.bf16.msra.mxu1 %v660_v4  ;;  %v549_v20 = vld [vmem:[%s1102_s4] ss:$0 sm:$0xff]  ;;  %s268_s7 = scalar_lea.vmem [#allocation8], %s543_s8  ;;  %s1054_s16 = scalar_lea.hbm %s1103_s5, %s556_s28 }
  0x6d   : > { %569 = vmatprep.subr.bf16.mxu0 %v829_v0  ;;  %577 = vmatprep.subr.bf16.mxu1 %v829_v0  ;;  %s443_s6 = sshll.u32 %s268_s7, 4  ;;  %s430_s9 = scalar_lea.sflag [#allocation4], %s1031_s12  ;;  %s1056_s6 = int_to_ptr.vmem [resolvable:$true] %s443_s6 }
  0x6e   : > { %s752_s22 = scalar_lea.vmem %s1056_s6, 128  ;;  %p1117_p0 = scmp.ne.s32.totalorder %s1112_s23, 0 }
  0x6f   : > { %p753_p8 = scmp.ne.s32.totalorder %s1056_s6, %s752_s22  ;;  %s831_s13 = smov [#allocation8]  }
  0x70   : > { %570 = vmatpush3.bf16.msra.mxu0 %v659_v2  ;;  %578 = vmatpush3.bf16.msra.mxu1 %v661_v5  ;;  %s756_s29 = sshll.u32 %s831_s13, 4  ;;  %s757_s29 = int_to_ptr.vmem [resolvable:$false] %s756_s29 }
  0x71   : > { %579 = vmatprep.subr.bf16.mxu1 %v829_v0  ;;  %p754_p1 = pnand %p753_p8, %p1117_p0  ;;  %s758_s17 = scalar_lea.vmem %s757_s29, 256 }
  0x72   : > { %p759_p7 = scmp.lt.s32.totalorder %s1056_s6, %s757_s29  ;;  %p760_p9 = scmp.lt.s32.totalorder %s758_s17, %s752_s22 }
  0x73   : > { %572 = vmatmul.mubr.msk.bf16.vlgmr.msra.gmra.mrb[0].mxu0 %vm294_vm1, %v270_v3  ;;  %p755_p3 = pneg %p754_p1 }
  0x74   : > { %580 = vmatpush3.bf16.msra.mxu1 %v662_v6  ;;  %p761_p12 = por %p760_p9, %p759_p7 }
  0x75   : > { %581 = vmatprep.subr.bf16.mxu1 %v829_v0 }
  0x76   : > { %p762_p2 = pnand %p761_p12, %p755_p3 }
  0x78   : > { %582 = vmatpush3.bf16.msra.mxu1 %v663_v7 }
 0x146   : > { %v332_v9 = vpop.f32.mrb[0].mxu0 }
 0x147   : > { %v333_v10 = vadd.f32 %v544_v8, %v332_v9  ;;  %v573_v11 = vpop.f32.mrb[1].mxu0 }
 0x148   : > { %v335_v12 = vpop.f32.mrb[2].mxu0 }
 0x149   : > { %v339_v13 = vmin.f32 %v333_v10, 0.0  ;;  %v574_v14 = vpop.f32.mrb[3].mxu0  ;;  %vm338_vm2 = vcmp.gt.f32.partialorder %v333_v10, 0.0 }
 0x14b   : > { %v340_v15 = vmul.f32 1.442695, %v339_v13 }
 0x14d   : > { %664 = vpow2.f32 %v340_v15 }
 0x157   : > { %v665_v16 = vpop.eup %664 }
 0x158   : > { %v548_v17 = vadd.f32 -1.0, %v665_v16 }
 0x15a   : > { %v343_v18 = vsel %vm338_vm2, %v333_v10, %v548_v17 }
 0x15b   : > { %v344_v19 = vpack.c.bf16 %v343_v18, %v343_v18 }
 0x15d   : > { %584 = vmatmul.mubr.msk.bf16.vlgmr.msra.gmra.mrb[0].mxu1 %vm384_vm3, %v344_v19 }
 0x230   : > { %v422_v21 = vpop.f32.mrb[0].mxu1 }
 0x231   : > { %v423_v22 = vadd.f32 %v549_v20, %v422_v21  ;;  %v585_v23 = vpop.f32.mrb[1].mxu1 }
 0x232   : > { %v425_v24 = vpop.f32.mrb[2].mxu1 }
 0x233   : > { %428 = vst [vmem:[%s268_s7] sm:$0xff] %v423_v22  ;;  %v586_v25 = vpop.f32.mrb[3].mxu1 }
 0x234   : > { %765 = shalt.err (!%p762_p2)
}
 0x235   : > { %s766_s12 = scalar_lea.hbm %s1054_s16, 128  ;;  %s770_s8 = scalar_lea.hbm %s1103_s5, 256 }
 0x236   : > { %p767_p13 = scmp.ne.s32.totalorder %s1054_s16, %s766_s12  ;;  %p771_p4 = scmp.lt.u32.totalorder %s1054_s16, %s1103_s5 }
 0x237   : > { %p772_p5 = scmp.lt.u32.totalorder %s770_s8, %s766_s12  ;;  %p774_p8 = scmp.lt.u32.totalorder %s766_s12, %s1054_s16 }
 0x238   : > { %p768_p6 = pnand %p767_p13, %p1117_p0 }
 0x239   : > { %p773_p11 = por %p772_p5, %p771_p4 }
 0x23a   : > { %p769_p10 = pneg %p768_p6 }
 0x23b   : > { %p775_p1 = por %p774_p8, %p773_p11 }
 0x23d   : > { %p776_p3 = pnand %p775_p1, %p769_p10 }
 0x23f   : > { %779 = shalt.err (!%p776_p3)
}
 0x240   : > { %597 = dma.vmem_to_hbm [thread:$0]  (%p1117_p0), %s1056_s6, 128, %s1054_s16, %s430_s9  }
 0x241 PF: > { %s455_s28 = sand.u32 1, %s810_s18   ;;  %p1118_p7 = scmp.ne.s32.totalorder %s1108_s25, 0 }
 0x242   : > { %p1119_p9 = scmp.ge.s32.totalorder %s822_s21, 2  ;;  %s456_s7 = scalar_lea.sflag [#allocation4], %s455_s28 }
 0x244   : > { %p611_p12 = pnand %p1119_p9, %p1118_p7 }
 0x246   : > { %805 = dma.done.wait (!%p611_p12), %s456_s7, 128  }
 0x247   : > { %807 = vsyncadd (!%p611_p12), %s456_s7, 4294967168  ;;  %p19_p2 = scmp.ge.s32.totalorder %s972_s14, 4   ;;  %s1120_s18 = smov %s814_s19 }
 0x248   : > { %s1121_s19 = smov %s818_s20  ;;  %s1122_s20 = smov %s988_s27 }
 0x249   : > { %s1123_s21 = smov %s972_s14  ;;  %21 = sbr.rel (!%p19_p2) target bundleno = 6 (0x6), region = 93 }
 0x250   :  { %461 = vsyncpa [#allocation3], 1 }
 0x251   :  { %463 = vsyncpa [#allocation3 + $0x1], 1 }
 0x252   :  { %464 = vsyncpa [#allocation6], 1 }
 0x253   :  { %465 = vsyncpa [#allocation4], 1 }
 0x254   :  { %467 = vsyncpa [#allocation4 + $0x1], 1 }

</bundles_post_ra>
